<compile_context>
chip_gen: v7x
topology: tpu7x:2x2x1
jax: 0.10.0
libtpu: 0.0.40
codegen_flags: <defaults>
</compile_context>

<pallas_src>
import functools
import math

import jax
import jax.numpy as jnp
from jax.experimental import pallas as pl
from jax.experimental.pallas import tpu as pltpu

LIMIT_A = -0.1
LIMIT_B = 1.1


def _l0_dense_kernel(x_ref, wt_ref, qzw_ref, bg_ref, o_ref, acc_ref, *, mxu_dtype):
    k = pl.program_id(2)

    @pl.when(k == 0)
    def _init():
        acc_ref[...] = jnp.zeros_like(acc_ref)

    stretch = LIMIT_B - LIMIT_A
    # Deterministic hard-concrete gate for this (tk, tn) weight tile (f32 math).
    z_w = jnp.clip(
        jax.nn.sigmoid(qzw_ref[...].astype(jnp.float32)) * stretch + LIMIT_A,
        0.0, 1.0)
    w_masked = (wt_ref[...].astype(jnp.float32) * z_w).astype(mxu_dtype)  # (tk, tn)

    acc_ref[...] += jnp.dot(
        x_ref[...].astype(mxu_dtype), w_masked,
        preferred_element_type=jnp.float32)

    @pl.when(k == pl.num_programs(2) - 1)
    def _finalize():
        bg = bg_ref[...].astype(jnp.float32)          # (2, tn): row 0 = bias, row 1 = qz logit
        z_b = jnp.clip(jax.nn.sigmoid(bg[1:2, :]) * stretch + LIMIT_A, 0.0, 1.0)
        out = acc_ref[...] + bg[0:1, :] * z_b         # broadcast (1, tn) over (tm, tn)
        o_ref[...] = out.astype(o_ref.dtype)


def _round_up(v, m):
    return (v + m - 1) // m * m


def l0_dense_bias_forward(x, weight, qz_loga, bias, *,
                          tm=None, tn=None, tk=None, mxu_dtype=None):
    """x: (B, In), weight: (Out, In), qz_loga: (Out, In+1), bias: (Out,)."""
    B, In = x.shape
    Out, In_w = weight.shape
    assert In_w == In and qz_loga.shape == (Out, In + 1) and bias.shape == (Out,)

    if mxu_dtype is None:
        mxu_dtype = x.dtype  # pass jnp.bfloat16 here for max MXU throughput on v6e/v7x

    # K-major layouts so the kernel needs no transpose.
    w_t = weight.T                                                     # (In, Out)
    qz_w_t = qz_loga[:, :In].T                                         # (In, Out)
    # Row 0 = bias, row 1 = bias-gate logit (both f32), one small epilogue input.
    bias_gate = jnp.stack(
        [bias.astype(jnp.float32), qz_loga[:, In].astype(jnp.float32)], axis=0)  # (2, Out)

    # Tile sizes: sublane-aligned M, lane/MXU-aligned N and K; biggest that
    # comfortably fits VMEM with double buffering.
    if tm is None:
        tm = min(_round_up(B, 8), 256)
    if tn is None:
        tn = min(_round_up(Out, 128), 256)
    if tk is None:
        tk = min(_round_up(In, 128), 512)

    Mp, Np, Kp = _round_up(B, tm), _round_up(Out, tn), _round_up(In, tk)

    # Zero-padding: padded weight rows/cols are 0, so the 0.5 gate produced by
    # padded (zero) qz logits contributes nothing; padded x columns are 0 too.
    x_p = jnp.pad(x, ((0, Mp - B), (0, Kp - In)))
    w_p = jnp.pad(w_t, ((0, Kp - In), (0, Np - Out)))
    qzw_p = jnp.pad(qz_w_t, ((0, Kp - In), (0, Np - Out)))
    bg_p = jnp.pad(bias_gate, ((0, 0), (0, Np - Out)))

    grid = (Mp // tm, Np // tn, Kp // tk)

    itemsize = jnp.dtype(jnp.float32).itemsize
    est_vmem = itemsize * (2 * (tm * tk + 2 * tk * tn + 2 * tn) + 3 * tm * tn)
    vmem_limit = int(min(max(2 * est_vmem, 16 * 1024 * 1024), 64 * 1024 * 1024))

    out_p = pl.pallas_call(
        functools.partial(_l0_dense_kernel, mxu_dtype=mxu_dtype),
        out_shape=jax.ShapeDtypeStruct((Mp, Np), x.dtype),
        grid_spec=pltpu.PrefetchScalarGridSpec(
            num_scalar_prefetch=0,
            grid=grid,
            in_specs=[
                pl.BlockSpec((tm, tk), lambda i, j, k: (i, k)),   # x
                pl.BlockSpec((tk, tn), lambda i, j, k: (k, j)),   # weight^T
                pl.BlockSpec((tk, tn), lambda i, j, k: (k, j)),   # qz gate logits (weight)
                pl.BlockSpec((2, tn), lambda i, j, k: (0, j)),    # [bias; bias-gate logit]
            ],
            out_specs=pl.BlockSpec((tm, tn), lambda i, j, k: (i, j)),
            scratch_shapes=[pltpu.VMEM((tm, tn), jnp.float32)],
        ),
        compiler_params=pltpu.CompilerParams(
            dimension_semantics=("parallel", "parallel", "arbitrary"),
            vmem_limit_bytes=vmem_limit,
        ),
    )(x_p, w_p, qzw_p, bg_p)

    return out_p[:B, :Out]


def _reference(x, weight, qz_loga, bias):
    stretch = LIMIT_B - LIMIT_A
    z = jnp.clip(jax.nn.sigmoid(qz_loga) * stretch + LIMIT_A, 0.0, 1.0)
    w = weight * z[:, :-1]
    b = bias * z[:, -1]
    return x @ w.T + b


def _make_params(key, in_features, out_features, droprate=0.5):
    kx, kw, kq, kb = jax.random.split(key, 4)
    # kaiming_uniform_(weight, mode='fan_out') -> U(-bound, bound), bound = sqrt(6/fan_out)
    bound = math.sqrt(6.0 / out_features)
    weight = jax.random.uniform(kw, (out_features, in_features),
                                minval=-bound, maxval=bound, dtype=jnp.float32)
    qz_mean = math.log(1 - droprate) - math.log(droprate)
    qz_loga = qz_mean + 0.01 * jax.random.normal(
        kq, (out_features, in_features + 1), dtype=jnp.float32)
    bias = 0.1 * jax.random.normal(kb, (out_features,), dtype=jnp.float32)
    return kx, weight, qz_loga, bias


if __name__ == "__main__":
    key = jax.random.PRNGKey(0)

    # --- test 1: module-sized shapes (single tile) ---
    in_features, out_features, batch = 32, 16, 8
    kx, weight, qz_loga, bias = _make_params(key, in_features, out_features)
    x = jax.random.normal(kx, (batch, in_features), dtype=jnp.float32)

    out = jax.block_until_ready(l0_dense_bias_forward(x, weight, qz_loga, bias))
    ref = _reference(x, weight, qz_loga, bias)
    assert out.shape == (batch, out_features)
    assert jnp.allclose(out, ref, atol=2e-5, rtol=2e-5)

    # --- test 2: exercises the (M, N, K) grid, padding, and accumulator path ---
    in_features, out_features, batch = 320, 192, 24
    kx2, weight2, qz_loga2, bias2 = _make_params(
        jax.random.PRNGKey(1), in_features, out_features)
    x2 = jax.random.normal(kx2, (batch, in_features), dtype=jnp.float32)

    out2 = jax.block_until_ready(
        l0_dense_bias_forward(x2, weight2, qz_loga2, bias2, tm=8, tn=128, tk=128))
    ref2 = _reference(x2, weight2, qz_loga2, bias2)
    assert out2.shape == (batch, out_features)
    assert jnp.allclose(out2, ref2, atol=1e-4, rtol=1e-4)

    print("KERNEL_OK")
</pallas_src>

<mosaic_0001>
module attributes {stable_mosaic.version = 11 : i64} {
  func.func @_l0_dense_kernel(%arg0: i32, %arg1: i32, %arg2: i32, %arg3: memref<8x128xf32, #tpu.memory_space<vmem>>, %arg4: memref<128x128xf32, #tpu.memory_space<vmem>>, %arg5: memref<128x128xf32, #tpu.memory_space<vmem>>, %arg6: memref<2x128xf32, #tpu.memory_space<vmem>>, %arg7: memref<8x128xf32, #tpu.memory_space<vmem>>, %arg8: memref<8x128xf32, #tpu.memory_space<vmem>>) attributes {dimension_semantics = [#tpu.dimension_semantics<parallel>, #tpu.dimension_semantics<parallel>, #tpu.dimension_semantics<arbitrary>], iteration_bounds = array<i64: 1, 1, 1>, scalar_prefetch = 0 : i64, scratch_operands = 1 : i64, tpu.core_type = #tpu.core_type<tc>, window_params = [{transform_indices = @transform_0, window_bounds = array<i64: 8, 128>}, {transform_indices = @transform_1, window_bounds = array<i64: 128, 128>}, {transform_indices = @transform_2, window_bounds = array<i64: 128, 128>}, {transform_indices = @transform_3, window_bounds = array<i64: 2, 128>}, {transform_indices = @transform_4, window_bounds = array<i64: 8, 128>}]} {
    %c0_i32 = arith.constant 0 : i32
    %0 = arith.cmpi eq, %arg2, %c0_i32 : i32
    %1 = arith.extui %0 : i1 to i32
    %c0_i32_0 = arith.constant 0 : i32
    %2 = arith.cmpi ne, %1, %c0_i32_0 : i32
    scf.if %2 {
      %cst_17 = arith.constant 0.000000e+00 : f32
      %27 = vector.broadcast %cst_17 : f32 to vector<8x128xf32>
      %c0_18 = arith.constant 0 : index
      %c0_19 = arith.constant 0 : index
      %28 = vector.load %arg8[%c0_18, %c0_19] : memref<8x128xf32, #tpu.memory_space<vmem>>, vector<8x128xf32>
      tpu.vector_store %arg8[%c0_18, %c0_19], %27 {strides = array<i32>} : memref<8x128xf32, #tpu.memory_space<vmem>>, vector<8x128xf32>,
    } else {
    }
    %c0 = arith.constant 0 : index
    %c0_1 = arith.constant 0 : index
    %3 = vector.load %arg5[%c0, %c0_1] : memref<128x128xf32, #tpu.memory_space<vmem>>, vector<128x128xf32>
    %4 = arith.negf %3 : vector<128x128xf32>
    %5 = math.exp %4 : vector<128x128xf32>
    %cst = arith.constant 1.000000e+00 : f32
    %6 = vector.broadcast %cst : f32 to vector<128x128xf32>
    %7 = arith.addf %6, %5 : vector<128x128xf32>
    %8 = arith.divf %6, %7 : vector<128x128xf32>
    %cst_2 = arith.constant 1.200000e+00 : f32
    %9 = vector.broadcast %cst_2 : f32 to vector<128x128xf32>
    %10 = arith.mulf %8, %9 : vector<128x128xf32>
    %cst_3 = arith.constant -1.000000e-01 : f32
    %11 = vector.broadcast %cst_3 : f32 to vector<128x128xf32>
    %12 = arith.addf %10, %11 : vector<128x128xf32>
    %cst_4 = arith.constant 0.000000e+00 : f32
    %cst_5 = arith.constant 1.000000e+00 : f32
    %13 = vector.broadcast %cst_4 : f32 to vector<128x128xf32>
    %14 = arith.maximumf %13, %12 : vector<128x128xf32>
    %15 = vector.broadcast %cst_5 : f32 to vector<128x128xf32>
    %16 = arith.minimumf %15, %14 : vector<128x128xf32>
    %c0_6 = arith.constant 0 : index
    %c0_7 = arith.constant 0 : index
    %17 = vector.load %arg4[%c0_6, %c0_7] : memref<128x128xf32, #tpu.memory_space<vmem>>, vector<128x128xf32>
    %18 = arith.mulf %17, %16 : vector<128x128xf32>
    %c0_8 = arith.constant 0 : index
    %c0_9 = arith.constant 0 : index
    %19 = vector.load %arg8[%c0_8, %c0_9] : memref<8x128xf32, #tpu.memory_space<vmem>>, vector<8x128xf32>
    %c0_10 = arith.constant 0 : index
    %c0_11 = arith.constant 0 : index
    %20 = vector.load %arg3[%c0_10, %c0_11] : memref<8x128xf32, #tpu.memory_space<vmem>>, vector<8x128xf32>
    %cst_12 = arith.constant dense<0.000000e+00> : vector<8x128xf32>
    %21 = tpu.matmul %20, %18, %cst_12 {dimension_numbers = #tpu.dot_dimension_numbers<[1], [0], [0], [1], [0, 0, 1, 1], [], []>} : vector<8x128xf32>, vector<128x128xf32>, vector<8x128xf32> -> vector<8x128xf32>
    %22 = arith.addf %19, %21 : vector<8x128xf32>
    %c0_13 = arith.constant 0 : index
    %c0_14 = arith.constant 0 : index
    %23 = vector.load %arg8[%c0_13, %c0_14] : memref<8x128xf32, #tpu.memory_space<vmem>>, vector<8x128xf32>
    tpu.vector_store %arg8[%c0_13, %c0_14], %22 {strides = array<i32>} : memref<8x128xf32, #tpu.memory_space<vmem>>, vector<8x128xf32>,
    %c0_i32_15 = arith.constant 0 : i32
    %24 = arith.cmpi eq, %arg2, %c0_i32_15 : i32
    %25 = arith.extui %24 : i1 to i32
    %c0_i32_16 = arith.constant 0 : i32
    %26 = arith.cmpi ne, %25, %c0_i32_16 : i32
    scf.if %26 {
      %c0_17 = arith.constant 0 : index
      %c0_18 = arith.constant 0 : index
      %27 = vector.load %arg6[%c0_17, %c0_18] : memref<2x128xf32, #tpu.memory_space<vmem>>, vector<2x128xf32>
      %28 = vector.extract_strided_slice %27 {offsets = [1, 0], sizes = [1, 128], strides = [1, 1]} : vector<2x128xf32> to vector<1x128xf32>
      %29 = arith.negf %28 : vector<1x128xf32>
      %30 = math.exp %29 : vector<1x128xf32>
      %cst_19 = arith.constant 1.000000e+00 : f32
      %31 = vector.broadcast %cst_19 : f32 to vector<1x128xf32>
      %32 = arith.addf %31, %30 : vector<1x128xf32>
      %33 = arith.divf %31, %32 : vector<1x128xf32>
      %cst_20 = arith.constant 1.200000e+00 : f32
      %34 = vector.broadcast %cst_20 : f32 to vector<1x128xf32>
      %35 = arith.mulf %33, %34 : vector<1x128xf32>
      %cst_21 = arith.constant -1.000000e-01 : f32
      %36 = vector.broadcast %cst_21 : f32 to vector<1x128xf32>
      %37 = arith.addf %35, %36 : vector<1x128xf32>
      %cst_22 = arith.constant 0.000000e+00 : f32
      %cst_23 = arith.constant 1.000000e+00 : f32
      %38 = vector.broadcast %cst_22 : f32 to vector<1x128xf32>
      %39 = arith.maximumf %38, %37 : vector<1x128xf32>
      %40 = vector.broadcast %cst_23 : f32 to vector<1x128xf32>
      %41 = arith.minimumf %40, %39 : vector<1x128xf32>
      %c0_24 = arith.constant 0 : index
      %c0_25 = arith.constant 0 : index
      %42 = vector.load %arg8[%c0_24, %c0_25] : memref<8x128xf32, #tpu.memory_space<vmem>>, vector<8x128xf32>
      %43 = vector.extract_strided_slice %27 {offsets = [0, 0], sizes = [1, 128], strides = [1, 1]} : vector<2x128xf32> to vector<1x128xf32>
      %44 = arith.mulf %43, %41 : vector<1x128xf32>
      %45 = vector.broadcast %44 : vector<1x128xf32> to vector<8x128xf32>
      %46 = arith.addf %42, %45 : vector<8x128xf32>
      %c0_26 = arith.constant 0 : index
      %c0_27 = arith.constant 0 : index
      %47 = vector.load %arg7[%c0_26, %c0_27] : memref<8x128xf32, #tpu.memory_space<vmem>>, vector<8x128xf32>
      tpu.vector_store %arg7[%c0_26, %c0_27], %46 {strides = array<i32>} : memref<8x128xf32, #tpu.memory_space<vmem>>, vector<8x128xf32>,
    } else {
    }
    return
  }
  func.func @transform_0(%arg0: i32, %arg1: i32, %arg2: i32) -> (i32, i32) {
    %c0_i32 = arith.constant 0 : i32
    return %arg0, %arg2 : i32, i32
  }
  func.func @transform_1(%arg0: i32, %arg1: i32, %arg2: i32) -> (i32, i32) {
    %c0_i32 = arith.constant 0 : i32
    return %arg2, %arg1 : i32, i32
  }
  func.func @transform_2(%arg0: i32, %arg1: i32, %arg2: i32) -> (i32, i32) {
    %c0_i32 = arith.constant 0 : i32
    return %arg2, %arg1 : i32, i32
  }
  func.func @transform_3(%arg0: i32, %arg1: i32, %arg2: i32) -> (i32, i32) {
    %c0_i32 = arith.constant 0 : i32
    %c0_i32_0 = arith.constant 0 : i32
    return %c0_i32, %arg1 : i32, i32
  }
  func.func @transform_4(%arg0: i32, %arg1: i32, %arg2: i32) -> (i32, i32) {
    %c0_i32 = arith.constant 0 : i32
    return %arg0, %arg1 : i32, i32
  }
}

</mosaic_0001>

<bundles_post_ra>
// kernel: tpu_custom_call.1
= control target key start
LH: loop header
LB: loop body
LE: loop exit
PB: predicated region body
PF: predicated region fallthrough
CT: control target
= control target key end

     0   :  { %9 = vsyncpa [#allocation4], 0  ;;  %s748_s0 = inlined_call_operand.hbm [shape: f32[8,128], index: 0, kind: input, shape index: {}]   ;;  %s749_s1 = inlined_call_operand.hbm [shape: f32[128,128], index: 1, kind: input, shape index: {}]   ;;  %s750_s2 = inlined_call_operand.hbm [shape: f32[128,128], index: 2, kind: input, shape index: {}]   ;;  %s751_s3 = inlined_call_operand.vmem [shape: f32[2,128], index: 3, kind: input, shape index: {}]   ;;  %s752_s4 = inlined_call_operand.hbm [shape: f32[8,128], index: 4, kind: output, shape index: {}]  }
   0x1   :  { %10 = vsyncpa [#allocation7], 0 }
   0x2   :  { %11 = vsyncpa [#allocation5], 0  ;;  %s649_s15 = smov [#allocation6]   ;;  %s555_s19 = scalar_lea.hbm %s749_s1, 2048 }
   0x3   :  { %s27_s16 = sshll.u32 %s649_s15, 4  ;;  %p556_p0 = scmp.ne.s32.totalorder %s749_s1, %s555_s19  ;;  %s28_s16 = int_to_ptr.vmem [resolvable:$true] %s27_s16 }
   0x4   :  { %p559_p1 = scmp.lt.u32.totalorder %s555_s19, %s749_s1 }
   0x6   :  { %p561_p2 = pnand %p559_p1, %p556_p0 }
   0x8   :  { %564 = shalt.err (!%p561_p2)
}
   0x9   :  { %s565_s24 = scalar_lea.vmem %s28_s16, 2048  ;;  %p570_p4 = scmp.lt.s32.totalorder %s28_s16, %s28_s16 }
   0xa   :  { %p566_p3 = scmp.ne.s32.totalorder %s28_s16, %s565_s24  ;;  %p571_p5 = scmp.lt.s32.totalorder %s565_s24, %s565_s24 }
   0xc   :  { %p572_p6 = por %p571_p5, %p570_p4 }
   0xe   :  { %p573_p7 = pnand %p572_p6, %p566_p3 }
  0x10   :  { %576 = shalt.err (!%p573_p7)
}
  0x11   :  { %s650_s25 = smov 128   ;;  %s651_s26 = smov 8  }
  0x12   :  { %33 = dma.hbm_to_vmem [thread:$0]  %s749_s1, 2048, %s28_s16, [#allocation7], %s650_s25, %s650_s25, %s651_s26  }
  0x13   :  { %s652_s29 = smov [#allocation3]   ;;  %s653_s5 = smov [#allocation8]  }
  0x14   :  { %s18_s30 = sshll.u32 %s652_s29, 4  ;;  %s39_s6 = sshll.u32 %s653_s5, 4  ;;  %s19_s30 = int_to_ptr.vmem [resolvable:$true] %s18_s30  ;;  %s40_s6 = int_to_ptr.vmem [resolvable:$true] %s39_s6 }
  0x15   :  { %s577_s9 = scalar_lea.hbm %s748_s0, 128 }
  0x16   :  { %p578_p8 = scmp.ne.s32.totalorder %s748_s0, %s577_s9  ;;  %p581_p9 = scmp.lt.u32.totalorder %s577_s9, %s748_s0 }
  0x18   :  { %p583_p10 = pnand %p581_p9, %p578_p8 }
  0x1a   :  { %586 = shalt.err (!%p583_p10)
}
  0x1b   :  { %s587_s1 = scalar_lea.vmem %s19_s30, 128  ;;  %p592_p12 = scmp.lt.s32.totalorder %s19_s30, %s19_s30 }
  0x1c   :  { %p588_p11 = scmp.ne.s32.totalorder %s19_s30, %s587_s1  ;;  %p593_p13 = scmp.lt.s32.totalorder %s587_s1, %s587_s1 }
  0x1e   :  { %p594_p0 = por %p593_p13, %p592_p12 }
  0x20   :  { %p595_p1 = pnand %p594_p0, %p588_p11 }
  0x22   :  { %598 = shalt.err (!%p595_p1)
}
  0x23   :  { %21 = dma.hbm_to_vmem [thread:$0]  %s748_s0, 128, %s19_s30, [#allocation4]  }
  0x24   :  { %s599_s18 = scalar_lea.hbm %s750_s2, 2048 }
  0x25   :  { %p600_p2 = scmp.ne.s32.totalorder %s750_s2, %s599_s18  ;;  %p603_p3 = scmp.lt.u32.totalorder %s599_s18, %s750_s2 }
  0x27   :  { %p605_p4 = pnand %p603_p3, %p600_p2 }
  0x29   :  { %608 = shalt.err (!%p605_p4)
}
  0x2a   :  { %s609_s23 = scalar_lea.vmem %s40_s6, 2048  ;;  %p614_p6 = scmp.lt.s32.totalorder %s40_s6, %s40_s6 }
  0x2b   :  { %p610_p5 = scmp.ne.s32.totalorder %s40_s6, %s609_s23  ;;  %p615_p7 = scmp.lt.s32.totalorder %s609_s23, %s609_s23 }
  0x2d   :  { %p616_p8 = por %p615_p7, %p614_p6 }
  0x2f   :  { %p617_p9 = pnand %p616_p8, %p610_p5 }
  0x31   :  { %620 = shalt.err (!%p617_p9)
}
  0x32   :  { %45 = dma.hbm_to_vmem [thread:$0]  %s750_s2, 2048, %s40_s6, [#allocation7], %s650_s25, %s650_s25, %s651_s26  }
  0x33   :  { %643 = dma.done.wait [#allocation4], 128  }
  0x34   :  { %644 = vsyncadd [#allocation4], 4294967168 }
  0x35   :  { %645 = dma.done.wait [#allocation7], 4096  }
  0x36   :  { %646 = vsyncadd [#allocation7], 4294963200  ;;  %v654_v0 = vmov 0.0|0.0   ;;  %vm655_vm0 = vmmov 0   ;;  %v656_v1 = vmov 0.0   ;;  %v62_v2 = vld [vmem:[#allocation8] sm:$0xff] }
  0x37   :  { %454 = vmatprep.subr.bf16.mxu0 %v654_v0  ;;  %451 = vmatprep.mubr.msk.f32.mxu0 %vm655_vm0, %v656_v1  ;;  %v63_v3 = vld [vmem:[#allocation8 + $0x8] sm:$0xff]  ;;  %v385_v4 = vmul.f32 -1.442695, %v62_v2  ;;  %v64_v6 = vld [vmem:[#allocation8 + $0x10] sm:$0xff]  ;;  %v65_v7 = vld [vmem:[#allocation8 + $0x18] sm:$0xff]  ;;  %s657_s26 = smov [#allocation9]  }
  0x38   :  { %v386_v5 = vmul.f32 -1.442695, %v63_v3  ;;  %v387_v8 = vmul.f32 -1.442695, %v64_v6  ;;  %v388_v9 = vmul.f32 -1.442695, %v65_v7 }
  0x39   :  { %487 = vpow2.f32 %v385_v4  ;;  %v66_v10 = vld [vmem:[#allocation8 + $0x20] sm:$0xff]  ;;  %v67_v11 = vld [vmem:[#allocation8 + $0x28] sm:$0xff]  ;;  %v68_v14 = vld [vmem:[#allocation8 + $0x30] sm:$0xff]  ;;  %s375_s27 = sshll.u32 %s657_s26, 4  ;;  %s376_s27 = int_to_ptr.vmem [resolvable:$true] %s375_s27 }
  0x3a   :  { %489 = vpow2.f32 %v386_v5  ;;  %v389_v12 = vmul.f32 -1.442695, %v66_v10  ;;  %v390_v13 = vmul.f32 -1.442695, %v67_v11  ;;  %v69_v15 = vld [vmem:[#allocation8 + $0x38] sm:$0xff]  ;;  %v70_v18 = vld [vmem:[#allocation8 + $0x40] sm:$0xff]  ;;  %p626_p11 = scmp.lt.s32.totalorder %s376_s27, %s376_s27 }
  0x3b   :  { %491 = vpow2.f32 %v387_v8  ;;  %v391_v16 = vmul.f32 -1.442695, %v68_v14  ;;  %v392_v17 = vmul.f32 -1.442695, %v69_v15  ;;  %v71_v19 = vld [vmem:[#allocation8 + $0x48] sm:$0xff]  ;;  %v72_v21 = vld [vmem:[#allocation8 + $0x50] sm:$0xff] }
  0x3c   :  { %493 = vpow2.f32 %v388_v9  ;;  %v393_v20 = vmul.f32 -1.442695, %v70_v18  ;;  %v394_v22 = vmul.f32 -1.442695, %v71_v19  ;;  %v73_v23 = vld [vmem:[#allocation8 + $0x58] sm:$0xff]  ;;  %v74_v25 = vld [vmem:[#allocation8 + $0x60] sm:$0xff] }
  0x3d   :  { %495 = vpow2.f32 %v389_v12  ;;  %v395_v24 = vmul.f32 -1.442695, %v72_v21  ;;  %v396_v26 = vmul.f32 -1.442695, %v73_v23  ;;  %v397_v27 = vmul.f32 -1.442695, %v74_v25 }
  0x3e   :  { %497 = vpow2.f32 %v390_v13  ;;  %v75_v47 = vld [vmem:[#allocation8 + $0x68] sm:$0xff]  ;;  %v76_v52 = vld [vmem:[#allocation8 + $0x70] sm:$0xff]  ;;  %v77_v56 = vld [vmem:[#allocation8 + $0x78] sm:$0xff] }
  0x3f   :  { %499 = vpow2.f32 %v391_v16  ;;  %v398_v55 = vmul.f32 -1.442695, %v75_v47  ;;  %v399_v61 = vmul.f32 -1.442695, %v76_v52  ;;  %v400_v1 = vmul.f32 -1.442695, %v77_v56 }
  0x40   :  { %501 = vpow2.f32 %v392_v17  ;;  %v238_v7 = vld [vmem:[#allocation6] sm:$0xff]  ;;  %v239_v11 = vld [vmem:[#allocation6 + $0x8] sm:$0xff]  ;;  %v240_v17 = vld [vmem:[#allocation6 + $0x10] sm:$0xff] }
  0x41   :  { %503 = vpow2.f32 %v393_v20 }
  0x42   :  { %505 = vpow2.f32 %v394_v22 }
  0x43   :  { %v488_v28 = vpop.eup %487  ;;  %507 = vpow2.f32 %v395_v24 }
  0x44   :  { %v490_v29 = vpop.eup %489  ;;  %v126_v30 = vadd.f32 1.0, %v488_v28  ;;  %509 = vpow2.f32 %v396_v26 }
  0x45   :  { %v492_v31 = vpop.eup %491  ;;  %v127_v32 = vadd.f32 1.0, %v490_v29  ;;  %511 = vpow2.f32 %v397_v27 }
  0x46   :  { %v494_v33 = vpop.eup %493  ;;  %513 = vrcp.f32 %v126_v30  ;;  %v128_v34 = vadd.f32 1.0, %v492_v31  ;;  %v241_v31 = vld [vmem:[#allocation6 + $0x18] sm:$0xff] }
  0x47   :  { %v496_v35 = vpop.eup %495  ;;  %515 = vrcp.f32 %v127_v32  ;;  %v129_v36 = vadd.f32 1.0, %v494_v33 }
  0x48   :  { %v498_v37 = vpop.eup %497  ;;  %517 = vrcp.f32 %v128_v34  ;;  %v130_v38 = vadd.f32 1.0, %v496_v35 }
  0x49   :  { %v500_v39 = vpop.eup %499  ;;  %519 = vrcp.f32 %v129_v36  ;;  %v131_v40 = vadd.f32 1.0, %v498_v37 }
  0x4a   :  { %v502_v41 = vpop.eup %501  ;;  %521 = vrcp.f32 %v130_v38  ;;  %v132_v42 = vadd.f32 1.0, %v500_v39  ;;  %v242_v38 = vld [vmem:[#allocation6 + $0x20] sm:$0xff] }
  0x4b   :  { %v504_v43 = vpop.eup %503  ;;  %523 = vrcp.f32 %v131_v40  ;;  %v133_v44 = vadd.f32 1.0, %v502_v41 }
  0x4c   :  { %v506_v45 = vpop.eup %505  ;;  %525 = vrcp.f32 %v132_v42  ;;  %v134_v46 = vadd.f32 1.0, %v504_v43  ;;  %v243_v43 = vld [vmem:[#allocation6 + $0x28] sm:$0xff] }
  0x4d   :  { %v508_v48 = vpop.eup %507  ;;  %527 = vrcp.f32 %v133_v44  ;;  %v135_v49 = vadd.f32 1.0, %v506_v45 }
  0x4e   :  { %v510_v50 = vpop.eup %509  ;;  %529 = vrcp.f32 %v134_v46  ;;  %v136_v51 = vadd.f32 1.0, %v508_v48 }
  0x4f   :  { %v512_v53 = vpop.eup %511  ;;  %v137_v54 = vadd.f32 1.0, %v510_v50  ;;  %531 = vrcp.f32 %v135_v49 }
  0x50   :  { %v514_v57 = vpop.eup %513  ;;  %v138_v58 = vadd.f32 1.0, %v512_v53  ;;  %533 = vrcp.f32 %v136_v51 }
  0x51   :  { %v516_v59 = vpop.eup %515  ;;  %v174_v60 = vmul.f32 1.2, %v514_v57  ;;  %535 = vrcp.f32 %v137_v54  ;;  %v244_v54 = vld [vmem:[#allocation6 + $0x30] sm:$0xff] }
  0x52   :  { %v518_v62 = vpop.eup %517  ;;  %v175_v63 = vmul.f32 1.2, %v516_v59  ;;  %537 = vpow2.f32 %v398_v55 }
  0x53   :  { %v520_v2 = vpop.eup %519  ;;  %v190_v3 = vadd.f32 -0.1, %v174_v60  ;;  %v176_v4 = vmul.f32 1.2, %v518_v62  ;;  %539 = vrcp.f32 %v138_v58 }
  0x54   :  { %v522_v5 = vpop.eup %521  ;;  %v191_v6 = vadd.f32 -0.1, %v175_v63  ;;  %v177_v8 = vmul.f32 1.2, %v520_v2  ;;  %541 = vpow2.f32 %v399_v61  ;;  %v245_v61 = vld [vmem:[#allocation6 + $0x38] sm:$0xff] }
  0x55   :  { %v524_v9 = vpop.eup %523  ;;  %v206_v10 = vmax.f32 %v190_v3, 0.0  ;;  %v192_v12 = vadd.f32 -0.1, %v176_v4  ;;  %v178_v13 = vmul.f32 1.2, %v522_v5  ;;  %543 = vpow2.f32 %v400_v1 }
  0x56   :  { %v526_v14 = vpop.eup %525  ;;  %v207_v15 = vmax.f32 %v191_v6, 0.0  ;;  %v193_v16 = vadd.f32 -0.1, %v177_v8  ;;  %v179_v18 = vmul.f32 1.2, %v524_v9 }
  0x57   :  { %v528_v19 = vpop.eup %527  ;;  %v222_v20 = vmin.f32 %v206_v10, 1.0  ;;  %v208_v21 = vmax.f32 %v192_v12, 0.0  ;;  %v194_v22 = vadd.f32 -0.1, %v178_v13  ;;  %v180_v23 = vmul.f32 1.2, %v526_v14 }
  0x58   :  { %v530_v24 = vpop.eup %529  ;;  %v223_v25 = vmin.f32 %v207_v15, 1.0  ;;  %v209_v26 = vmax.f32 %v193_v16, 0.0  ;;  %v195_v27 = vadd.f32 -0.1, %v179_v18  ;;  %v181_v28 = vmul.f32 1.2, %v528_v19 }
  0x59   :  { %v254_v29 = vmul.f32 %v238_v7, %v222_v20  ;;  %v224_v30 = vmin.f32 %v208_v21, 1.0  ;;  %v210_v32 = vmax.f32 %v194_v22, 0.0  ;;  %v196_v33 = vadd.f32 -0.1, %v180_v23  ;;  %v532_v34 = vpop.eup %531  ;;  %v246_v13 = vld [vmem:[#allocation6 + $0x40] sm:$0xff] }
  0x5a   :  { %v255_v35 = vmul.f32 %v239_v11, %v223_v25  ;;  %v225_v36 = vmin.f32 %v209_v26, 1.0  ;;  %v211_v37 = vmax.f32 %v195_v27, 0.0  ;;  %v197_v39 = vadd.f32 -0.1, %v181_v28  ;;  %v534_v40 = vpop.eup %533  ;;  %v248_v26 = vld [vmem:[#allocation6 + $0x50] sm:$0xff]  ;;  %v249_v27 = vld [vmem:[#allocation6 + $0x58] sm:$0xff] }
  0x5b   :  { %v256_v41 = vmul.f32 %v240_v17, %v224_v30  ;;  %v226_v42 = vmin.f32 %v210_v32, 1.0  ;;  %v212_v44 = vmax.f32 %v196_v33, 0.0  ;;  %v182_v45 = vmul.f32 1.2, %v530_v24  ;;  %v536_v46 = vpop.eup %535  ;;  %v247_v17 = vld [vmem:[#allocation6 + $0x48] sm:$0xff] }
  0x5c   :  { %v455_v47 = vpack.c.bf16 %v255_v35, %v254_v29  ;;  %v257_v48 = vmul.f32 %v241_v31, %v225_v36  ;;  %v227_v49 = vmin.f32 %v211_v37, 1.0  ;;  %v213_v50 = vmax.f32 %v197_v39, 0.0  ;;  %v538_v51 = vpop.eup %537 }
  0x5d   :  { %v258_v52 = vmul.f32 %v242_v38, %v226_v42  ;;  %v228_v53 = vmin.f32 %v212_v44, 1.0  ;;  %v183_v55 = vmul.f32 1.2, %v532_v34  ;;  %v198_v56 = vadd.f32 -0.1, %v182_v45  ;;  %v540_v57 = vpop.eup %539  ;;  %v251_v45 = vld [vmem:[#allocation6 + $0x68] sm:$0xff] }
  0x5e   :  { %456 = vmatpush3.bf16.msra.mxu0 %v455_v47  ;;  %v458_v58 = vpack.c.bf16 %v257_v48, %v256_v41  ;;  %v259_v59 = vmul.f32 %v243_v43, %v227_v49  ;;  %v229_v60 = vmin.f32 %v213_v50, 1.0  ;;  %v184_v62 = vmul.f32 1.2, %v534_v40  ;;  %v542_v63 = vpop.eup %541  ;;  %v250_v41 = vld [vmem:[#allocation6 + $0x60] sm:$0xff]  ;;  %v252_v50 = vld [vmem:[#allocation6 + $0x70] sm:$0xff] }
  0x5f   :  { %457 = vmatprep.subr.bf16.mxu0 %v654_v0  ;;  %v199_v1 = vadd.f32 -0.1, %v183_v55  ;;  %v214_v2 = vmax.f32 %v198_v56, 0.0  ;;  %v185_v3 = vmul.f32 1.2, %v536_v46  ;;  %v544_v4 = vpop.eup %543  ;;  %v260_v5 = vmul.f32 %v244_v54, %v228_v53  ;;  %v253_v54 = vld [vmem:[#allocation6 + $0x78] sm:$0xff] }
  0x60   :  { %v200_v6 = vadd.f32 -0.1, %v184_v62  ;;  %v139_v7 = vadd.f32 1.0, %v538_v51  ;;  %v261_v8 = vmul.f32 %v245_v61, %v229_v60  ;;  %v461_v12 = vpack.c.bf16 %v259_v59, %v258_v52  ;;  %v271_v60 = vld [vmem:[#allocation3] sm:$0xff] }
  0x61   :  { %v215_v9 = vmax.f32 %v199_v1, 0.0  ;;  %v230_v10 = vmin.f32 %v214_v2, 1.0  ;;  %v201_v11 = vadd.f32 -0.1, %v185_v3  ;;  %v140_v15 = vadd.f32 1.0, %v542_v63 }
  0x62   :  { %459 = vmatpush3.bf16.msra.mxu0 %v458_v58  ;;  %v216_v14 = vmax.f32 %v200_v6, 0.0  ;;  %545 = vrcp.f32 %v139_v7  ;;  %v186_v19 = vmul.f32 1.2, %v540_v57  ;;  %v141_v20 = vadd.f32 1.0, %v544_v4  ;;  %v347_v61 = vld [vmem:[%s751_s3] sm:$0x3] }
  0x63   :  { %460 = vmatprep.subr.bf16.mxu0 %v654_v0  ;;  %v231_v16 = vmin.f32 %v215_v9, 1.0  ;;  %v217_v18 = vmax.f32 %v201_v11, 0.0  ;;  %547 = vrcp.f32 %v140_v15  ;;  %v464_v21 = vpack.c.bf16 %v261_v8, %v260_v5  ;;  %s621_s3 = scalar_lea.vmem %s376_s27, 128 }
  0x64   :  { %v262_v22 = vmul.f32 %v246_v13, %v230_v10  ;;  %v232_v24 = vmin.f32 %v216_v14, 1.0  ;;  %549 = vrcp.f32 %v141_v20  ;;  %v202_v28 = vadd.f32 -0.1, %v186_v19  ;;  %p622_p10 = scmp.ne.s32.totalorder %s376_s27, %s621_s3  ;;  %p627_p12 = scmp.lt.s32.totalorder %s621_s3, %s621_s3 }
  0x65   :  { %v263_v23 = vmul.f32 %v247_v17, %v231_v16  ;;  %v233_v25 = vmin.f32 %v217_v18, 1.0  ;;  %v401_v62 = vmul.f32 -1.442695, %v347_v61  ;;  %v363_v7 = vlaneseq }
  0x66   :  { %462 = vmatpush3.bf16.msra.mxu0 %v461_v12  ;;  %v264_v30 = vmul.f32 %v248_v26, %v232_v24  ;;  %v218_v32 = vmax.f32 %v202_v28, 0.0  ;;  %p628_p13 = por %p627_p12, %p626_p11 }
  0x67   :  { %463 = vmatprep.subr.bf16.mxu0 %v654_v0  ;;  %v467_v29 = vpack.c.bf16 %v263_v23, %v262_v22  ;;  %v265_v31 = vmul.f32 %v249_v27, %v233_v25  ;;  %551 = vpow2.f32 %v401_v62  ;;  %v364_v8 = vshrl.u32 %v363_v7, 7 }
  0x68   :  { %v234_v38 = vmin.f32 %v218_v32, 1.0  ;;  %p629_p0 = pnand %p628_p13, %p622_p10 }
  0x69   :  { %v470_v36 = vpack.c.bf16 %v265_v31, %v264_v30  ;;  %v365_v10 = vsub.s32 0, %v364_v8 }
  0x6a   :  { %465 = vmatpush3.bf16.msra.mxu0 %v464_v21  ;;  %v266_v47 = vmul.f32 %v250_v41, %v234_v38 }
  0x6b   :  { %466 = vmatprep.subr.bf16.mxu0 %v654_v0 }
  0x6c   :  { %v546_v33 = vpop.eup %545 }
  0x6d   :  { %v187_v34 = vmul.f32 1.2, %v546_v33  ;;  %v548_v35 = vpop.eup %547 }
  0x6e   :  { %468 = vmatpush3.bf16.msra.mxu0 %v467_v29  ;;  %v188_v39 = vmul.f32 1.2, %v548_v35  ;;  %v550_v40 = vpop.eup %549 }
  0x6f   :  { %469 = vmatprep.subr.bf16.mxu0 %v654_v0  ;;  %v203_v37 = vadd.f32 -0.1, %v187_v34  ;;  %v189_v43 = vmul.f32 1.2, %v550_v40 }
  0x70   :  { %v204_v44 = vadd.f32 -0.1, %v188_v39 }
  0x71   :  { %v219_v42 = vmax.f32 %v203_v37, 0.0  ;;  %v205_v48 = vadd.f32 -0.1, %v189_v43  ;;  %v552_v63 = vpop.eup %551 }
  0x72   :  { %471 = vmatpush3.bf16.msra.mxu0 %v470_v36  ;;  %v220_v49 = vmax.f32 %v204_v44, 0.0  ;;  %v351_v1 = vadd.f32 1.0, %v552_v63 }
  0x73   :  { %472 = vmatprep.subr.bf16.mxu0 %v654_v0  ;;  %v235_v46 = vmin.f32 %v219_v42, 1.0  ;;  %v221_v52 = vmax.f32 %v205_v48, 0.0 }
  0x74   :  { %v236_v53 = vmin.f32 %v220_v49, 1.0  ;;  %553 = vrcp.f32 %v351_v1 }
  0x75   :  { %v267_v51 = vmul.f32 %v251_v45, %v235_v46  ;;  %v237_v56 = vmin.f32 %v221_v52, 1.0 }
  0x76   :  { %v268_v57 = vmul.f32 %v252_v50, %v236_v53 }
  0x77   :  { %v473_v55 = vpack.c.bf16 %v267_v51, %v266_v47  ;;  %v269_v58 = vmul.f32 %v253_v54, %v237_v56 }
  0x79   :  { %474 = vmatpush3.bf16.msra.mxu0 %v473_v55  ;;  %v476_v59 = vpack.c.bf16 %v269_v58, %v268_v57 }
  0x7a   :  { %475 = vmatprep.subr.bf16.mxu0 %v654_v0 }
  0x7d   :  { %477 = vmatpush3.bf16.msra.mxu0 %v476_v59 }
  0x7e   :  { %v554_v2 = vpop.eup %553 }
  0x7f   :  { %v354_v3 = vmul.f32 1.2, %v554_v2 }
  0x80   :  { %452 = vmatmul.mubr.f32.vlgmr.msra.gmra.mrb[0].mxu0 %v271_v60 }
  0x81   :  { %v355_v4 = vadd.f32 -0.1, %v354_v3 }
  0x83   :  { %v356_v5 = vmax.f32 %v355_v4, 0.0 }
  0x85   :  { %v357_v6 = vmin.f32 %v356_v5, 1.0 }
  0x87   :  { %v360_v0 = vrot.slane %v357_v6, 1 }
  0x89   :  { %v362_v9 = vmul.f32 %v360_v0, %v347_v61 }
  0x8b   :  { %v366_v11 = vrot.slane %v362_v9, %v365_v10 }
 0x153   :  { %v338_v12 = vpop.f32.mrb[0].mxu0 }
 0x154   :  { %v367_v13 = vadd.f32 %v366_v11, %v338_v12  ;;  %v453_v14 = vpop.f32.mrb[1].mxu0 }
 0x156   :  { %368 = vst [vmem:[#allocation9] sm:$0xff] %v367_v13 }
 0x157   :  { %632 = shalt.err (!%p629_p0)
}
 0x158   :  { %s633_s30 = scalar_lea.hbm %s752_s4, 128 }
 0x159   :  { %p634_p1 = scmp.ne.s32.totalorder %s752_s4, %s633_s30  ;;  %p637_p2 = scmp.lt.u32.totalorder %s633_s30, %s752_s4 }
 0x15b   :  { %p639_p3 = pnand %p637_p2, %p634_p1 }
 0x15d   :  { %642 = shalt.err (!%p639_p3)
}
 0x15e   :  { %378 = dma.vmem_to_hbm [thread:$0]  %s376_s27, 128, %s752_s4, [#allocation5]  }
 0x15f   :  { %647 = dma.done.wait [#allocation5], 128  }
 0x160   :  { %648 = vsyncadd [#allocation5], 4294967168 }
 0x161   :  { %382 = vsyncpa [#allocation4], 1 }
 0x162   :  { %383 = vsyncpa [#allocation7], 1 }
 0x163   :  { %384 = vsyncpa [#allocation5], 1 }

</bundles_post_ra>
